<compile_context>
chip_gen: v7x
topology: tpu7x:2x2x1
jax: 0.10.0
libtpu: 0.0.40
codegen_flags: <defaults>
</compile_context>

<pallas_src>
import jax
import jax.numpy as jnp
from jax.experimental import pallas as pl
from jax.experimental.pallas import tpu as pltpu

LANE = 128


def policy_net_kernel(x_ref, w1_ref, b1_ref, w2_ref, b2_ref, w3_ref, b3_ref, o_ref):
    # x.type(torch.float32); x is feature-major: (in_dim, TB)
    x = x_ref[...].astype(jnp.float32)
    in_dim = x.shape[0]

    # Linear(2,128) + ReLU as VPU broadcast-FMAs over the tiny K=2 contraction.
    # x[k:k+1, :] is a sublane-row slice (near-free broadcast across sublanes);
    # w1[:, k:k+1] is a small (128,1) column, lane-broadcast once per tile.
    h1 = w1_ref[:, 0:1] * x[0:1, :]
    for k in range(1, in_dim):
        h1 = h1 + w1_ref[:, k : k + 1] * x[k : k + 1, :]
    h1 = jnp.maximum(h1 + b1_ref[...], 0.0)                      # (128, TB)

    # Linear(128,32) + ReLU — MXU, batch on the N (lane) axis.
    h2 = jnp.dot(w2_ref[...], h1, preferred_element_type=jnp.float32) + b2_ref[...]
    h2 = jnp.maximum(h2, 0.0)                                    # (32, TB)

    # Linear(32,5) — MXU, batch on N.
    logits = jnp.dot(w3_ref[...], h2, preferred_element_type=jnp.float32) + b3_ref[...]  # (out_dim, TB)

    # Softmax over the feature rows (axis=0 == sublanes), numerically stable.
    # Exact division so probabilities sum to 1 (approx reciprocal saves nothing
    # at 5 rows and broke the sum-to-1 invariant).
    m = jnp.max(logits, axis=0, keepdims=True)
    e = jnp.exp(logits - m)
    denom = jnp.sum(e, axis=0, keepdims=True)
    o_ref[...] = e / denom


def _round_up(n, m):
    return ((n + m - 1) // m) * m


def _pick_batch_tile(B, tb):
    """Lane-axis batch tile: multiple of 128, and >=2 grid steps when B > 128
    so v7x megacore gets both TensorCores busy (no-op on v5e/v6e)."""
    if B <= LANE:
        return B  # single block == full lane extent (satisfies block-shape rule)
    half = _round_up(pl.cdiv(B, 2), LANE)
    return max(LANE, min(_round_up(tb, LANE), half))


def policy_net_forward(x, params, tb=2048):
    """Fused PolicyNet forward. x: (B, input_dim) -> (B, output_dim) probs.

    params: (w1, b1, w2, b2, w3, b3) with weights in torch-native (out, in)
    layout and biases as (out, 1).
    """
    w1, b1, w2, b2, w3, b3 = params
    B, in_dim = x.shape
    out_dim = w3.shape[0]

    # Feature-major (batch-on-lanes) layout for the kernel.
    x_t = x.astype(jnp.float32).T                                # (in_dim, B)

    TB = _pick_batch_tile(B, tb)
    grid = (pl.cdiv(B, TB),)

    # Weights/biases: one full block, constant index_map -> DMA'd once and
    # VMEM-resident across the whole batch grid.
    def resident(arr):
        nd = arr.ndim
        return pl.BlockSpec(arr.shape, lambda i, _nd=nd: (0,) * _nd)

    weight_bytes = sum(int(p.size) * 4 for p in params)
    cost = pl.CostEstimate(
        flops=2 * B * (in_dim * 128 + 128 * 32 + 32 * out_dim),
        transcendentals=B * out_dim,                             # exp in the softmax
        bytes_accessed=B * in_dim * 4 + weight_bytes + B * out_dim * 4,
    )

    out_t = pl.pallas_call(
        policy_net_kernel,
        out_shape=jax.ShapeDtypeStruct((out_dim, B), jnp.float32),
        grid=grid,
        in_specs=[
            pl.BlockSpec((in_dim, TB), lambda i: (0, i)),        # x, lane-dense
            resident(w1), resident(b1),
            resident(w2), resident(b2),
            resident(w3), resident(b3),
        ],
        out_specs=pl.BlockSpec((out_dim, TB), lambda i: (0, i)), # lane-dense store
        compiler_params=pltpu.CompilerParams(
            dimension_semantics=("parallel",),                   # 2 TCs on v7x
        ),
        cost_estimate=cost,
    )(x_t, w1, b1, w2, b2, w3, b3)

    return out_t.T                                               # (B, out_dim)


def init_params(key, input_dim=2, output_dim=5):
    """Deterministic init mimicking PyTorch Linear default (uniform +/- 1/sqrt(fan_in)).
    Weights in torch-native (out, in) layout; biases as (out, 1)."""
    dims = [(input_dim, 128), (128, 32), (32, output_dim)]
    params = []
    for i, (fan_in, fan_out) in enumerate(dims):
        kw, kb = jax.random.split(jax.random.fold_in(key, i))
        bound = 1.0 / (fan_in ** 0.5)
        w = jax.random.uniform(kw, (fan_out, fan_in), jnp.float32, -bound, bound)
        b = jax.random.uniform(kb, (fan_out, 1), jnp.float32, -bound, bound)
        params += [w, b]
    return tuple(params)


def reference_forward(x, params):
    w1, b1, w2, b2, w3, b3 = params
    x = x.astype(jnp.float32)
    h1 = jnp.maximum(x @ w1.T + b1.T, 0.0)
    h2 = jnp.maximum(h1 @ w2.T + b2.T, 0.0)
    logits = h2 @ w3.T + b3.T
    return jax.nn.softmax(logits, axis=1)


if __name__ == "__main__":
    key = jax.random.PRNGKey(0)
    k_param, k_x = jax.random.split(key)

    input_dim, output_dim, batch = 2, 5, 256
    params = init_params(k_param, input_dim, output_dim)
    x = jax.random.normal(k_x, (batch, input_dim), jnp.float32)

    # batch=256 -> TB=128 -> a 2-step batch grid (exercises tiling + megacore path).
    out = policy_net_forward(x, params)
    out = jax.block_until_ready(out)

    ref = reference_forward(x, params)
    assert out.shape == (batch, output_dim)
    assert jnp.allclose(out, ref, atol=1e-3, rtol=1e-3)
    # Exact division in the kernel -> rows sum to 1 up to f32 rounding.
    assert jnp.allclose(jnp.sum(out, axis=1), jnp.ones((batch,)), atol=1e-5)

    print("KERNEL_OK")
</pallas_src>

<mosaic_0001>
module attributes {stable_mosaic.version = 11 : i64} {
  func.func @policy_net_kernel(%arg0: i32, %arg1: memref<2x128xf32, #tpu.memory_space<vmem>>, %arg2: memref<128x2xf32, #tpu.memory_space<vmem>>, %arg3: memref<128x1xf32, #tpu.memory_space<vmem>>, %arg4: memref<32x128xf32, #tpu.memory_space<vmem>>, %arg5: memref<32x1xf32, #tpu.memory_space<vmem>>, %arg6: memref<5x32xf32, #tpu.memory_space<vmem>>, %arg7: memref<5x1xf32, #tpu.memory_space<vmem>>, %arg8: memref<5x128xf32, #tpu.memory_space<vmem>>) attributes {dimension_semantics = [#tpu.dimension_semantics<parallel>], iteration_bounds = array<i64: 2>, scalar_prefetch = 0 : i64, scratch_operands = 0 : i64, tpu.core_type = #tpu.core_type<tc>, window_params = [{transform_indices = @transform_0, window_bounds = array<i64: 2, 128>}, {pipeline_mode = #tpu.pipeline_mode<synchronous>, transform_indices = @transform_1, window_bounds = array<i64: 128, 2>}, {pipeline_mode = #tpu.pipeline_mode<synchronous>, transform_indices = @transform_2, window_bounds = array<i64: 128, 1>}, {pipeline_mode = #tpu.pipeline_mode<synchronous>, transform_indices = @transform_3, window_bounds = array<i64: 32, 128>}, {pipeline_mode = #tpu.pipeline_mode<synchronous>, transform_indices = @transform_4, window_bounds = array<i64: 32, 1>}, {pipeline_mode = #tpu.pipeline_mode<synchronous>, transform_indices = @transform_5, window_bounds = array<i64: 5, 32>}, {pipeline_mode = #tpu.pipeline_mode<synchronous>, transform_indices = @transform_6, window_bounds = array<i64: 5, 1>}, {transform_indices = @transform_7, window_bounds = array<i64: 5, 128>}]} {
    %c0 = arith.constant 0 : index
    %c0_0 = arith.constant 0 : index
    %0 = vector.load %arg1[%c0, %c0_0] : memref<2x128xf32, #tpu.memory_space<vmem>>, vector<2x128xf32>
    %c0_1 = arith.constant 0 : index
    %c0_2 = arith.constant 0 : index
    %1 = vector.load %arg2[%c0_1, %c0_2] : memref<128x2xf32, #tpu.memory_space<vmem>>, vector<128x1xf32>
    %2 = vector.extract_strided_slice %0 {offsets = [0, 0], sizes = [1, 128], strides = [1, 1]} : vector<2x128xf32> to vector<1x128xf32>
    %3 = vector.broadcast %1 : vector<128x1xf32> to vector<128x128xf32>
    %4 = vector.broadcast %2 : vector<1x128xf32> to vector<128x128xf32>
    %5 = arith.mulf %3, %4 : vector<128x128xf32>
    %c0_3 = arith.constant 0 : index
    %c1 = arith.constant 1 : index
    %6 = vector.load %arg2[%c0_3, %c1] : memref<128x2xf32, #tpu.memory_space<vmem>>, vector<128x1xf32>
    %7 = vector.extract_strided_slice %0 {offsets = [1, 0], sizes = [1, 128], strides = [1, 1]} : vector<2x128xf32> to vector<1x128xf32>
    %8 = vector.broadcast %6 : vector<128x1xf32> to vector<128x128xf32>
    %9 = vector.broadcast %7 : vector<1x128xf32> to vector<128x128xf32>
    %10 = arith.mulf %8, %9 : vector<128x128xf32>
    %11 = arith.addf %5, %10 : vector<128x128xf32>
    %c0_4 = arith.constant 0 : index
    %c0_5 = arith.constant 0 : index
    %12 = vector.load %arg3[%c0_4, %c0_5] : memref<128x1xf32, #tpu.memory_space<vmem>>, vector<128x1xf32>
    %13 = vector.broadcast %12 : vector<128x1xf32> to vector<128x128xf32>
    %14 = arith.addf %11, %13 : vector<128x128xf32>
    %cst = arith.constant 0.000000e+00 : f32
    %15 = vector.broadcast %cst : f32 to vector<128x128xf32>
    %16 = arith.maximumf %14, %15 : vector<128x128xf32>
    %c0_6 = arith.constant 0 : index
    %c0_7 = arith.constant 0 : index
    %17 = vector.load %arg4[%c0_6, %c0_7] : memref<32x128xf32, #tpu.memory_space<vmem>>, vector<32x128xf32>
    %cst_8 = arith.constant dense<0.000000e+00> : vector<32x128xf32>
    %18 = tpu.matmul %17, %16, %cst_8 {dimension_numbers = #tpu.dot_dimension_numbers<[1], [0], [0], [1], [0, 0, 1, 1], [], []>} : vector<32x128xf32>, vector<128x128xf32>, vector<32x128xf32> -> vector<32x128xf32>
    %c0_9 = arith.constant 0 : index
    %c0_10 = arith.constant 0 : index
    %19 = vector.load %arg5[%c0_9, %c0_10] : memref<32x1xf32, #tpu.memory_space<vmem>>, vector<32x1xf32>
    %20 = vector.broadcast %19 : vector<32x1xf32> to vector<32x128xf32>
    %21 = arith.addf %18, %20 : vector<32x128xf32>
    %cst_11 = arith.constant 0.000000e+00 : f32
    %22 = vector.broadcast %cst_11 : f32 to vector<32x128xf32>
    %23 = arith.maximumf %21, %22 : vector<32x128xf32>
    %c0_12 = arith.constant 0 : index
    %c0_13 = arith.constant 0 : index
    %24 = vector.load %arg6[%c0_12, %c0_13] : memref<5x32xf32, #tpu.memory_space<vmem>>, vector<5x32xf32>
    %cst_14 = arith.constant dense<0.000000e+00> : vector<5x128xf32>
    %25 = tpu.matmul %24, %23, %cst_14 {dimension_numbers = #tpu.dot_dimension_numbers<[1], [0], [0], [1], [0, 0, 1, 1], [], []>} : vector<5x32xf32>, vector<32x128xf32>, vector<5x128xf32> -> vector<5x128xf32>
    %c0_15 = arith.constant 0 : index
    %c0_16 = arith.constant 0 : index
    %26 = vector.load %arg7[%c0_15, %c0_16] : memref<5x1xf32, #tpu.memory_space<vmem>>, vector<5x1xf32>
    %27 = vector.broadcast %26 : vector<5x1xf32> to vector<5x128xf32>
    %28 = arith.addf %25, %27 : vector<5x128xf32>
    %cst_17 = arith.constant dense<0xFF800000> : vector<128xf32>
    %29 = vector.multi_reduction <maximumf>, %28, %cst_17 [0] : vector<5x128xf32> to vector<128xf32>
    %30 = vector.shape_cast %29 : vector<128xf32> to vector<1x128xf32>
    %31 = vector.broadcast %30 : vector<1x128xf32> to vector<5x128xf32>
    %32 = arith.subf %28, %31 : vector<5x128xf32>
    %33 = math.exp %32 : vector<5x128xf32>
    %cst_18 = arith.constant dense<0.000000e+00> : vector<128xf32>
    %34 = vector.multi_reduction <add>, %33, %cst_18 [0] : vector<5x128xf32> to vector<128xf32>
    %35 = vector.shape_cast %34 : vector<128xf32> to vector<1x128xf32>
    %36 = vector.broadcast %35 : vector<1x128xf32> to vector<5x128xf32>
    %37 = arith.divf %33, %36 : vector<5x128xf32>
    %c0_19 = arith.constant 0 : index
    %c0_20 = arith.constant 0 : index
    %38 = vector.load %arg8[%c0_19, %c0_20] : memref<5x128xf32, #tpu.memory_space<vmem>>, vector<5x128xf32>
    tpu.vector_store %arg8[%c0_19, %c0_20], %37 {strides = array<i32>} : memref<5x128xf32, #tpu.memory_space<vmem>>, vector<5x128xf32>,
    return
  }
  func.func @transform_0(%arg0: i32) -> (i32, i32) {
    %c0_i32 = arith.constant 0 : i32
    %c0_i32_0 = arith.constant 0 : i32
    return %c0_i32, %arg0 : i32, i32
  }
  func.func @transform_1(%arg0: i32) -> (i32, i32) {
    %c0_i32 = arith.constant 0 : i32
    %c0_i32_0 = arith.constant 0 : i32
    %c0_i32_1 = arith.constant 0 : i32
    return %c0_i32, %c0_i32_0 : i32, i32
  }
  func.func @transform_2(%arg0: i32) -> (i32, i32) {
    %c0_i32 = arith.constant 0 : i32
    %c0_i32_0 = arith.constant 0 : i32
    %c0_i32_1 = arith.constant 0 : i32
    return %c0_i32, %c0_i32_0 : i32, i32
  }
  func.func @transform_3(%arg0: i32) -> (i32, i32) {
    %c0_i32 = arith.constant 0 : i32
    %c0_i32_0 = arith.constant 0 : i32
    %c0_i32_1 = arith.constant 0 : i32
    return %c0_i32, %c0_i32_0 : i32, i32
  }
  func.func @transform_4(%arg0: i32) -> (i32, i32) {
    %c0_i32 = arith.constant 0 : i32
    %c0_i32_0 = arith.constant 0 : i32
    %c0_i32_1 = arith.constant 0 : i32
    return %c0_i32, %c0_i32_0 : i32, i32
  }
  func.func @transform_5(%arg0: i32) -> (i32, i32) {
    %c0_i32 = arith.constant 0 : i32
    %c0_i32_0 = arith.constant 0 : i32
    %c0_i32_1 = arith.constant 0 : i32
    return %c0_i32, %c0_i32_0 : i32, i32
  }
  func.func @transform_6(%arg0: i32) -> (i32, i32) {
    %c0_i32 = arith.constant 0 : i32
    %c0_i32_0 = arith.constant 0 : i32
    %c0_i32_1 = arith.constant 0 : i32
    return %c0_i32, %c0_i32_0 : i32, i32
  }
  func.func @transform_7(%arg0: i32) -> (i32, i32) {
    %c0_i32 = arith.constant 0 : i32
    %c0_i32_0 = arith.constant 0 : i32
    return %c0_i32, %arg0 : i32, i32
  }
}

</mosaic_0001>

<bundles_post_ra>
// kernel: tpu_custom_call.1
= control target key start
LH: loop header
LB: loop body
LE: loop exit
PB: predicated region body
PF: predicated region fallthrough
CT: control target
= control target key end

     0   :  { %12 = vsyncpa [#allocation3], 0  ;;  %s1512_s0 = inlined_call_operand.vmem [shape: f32[2,256], index: 0, kind: input, shape index: {}]   ;;  %s1513_s1 = inlined_call_operand.vmem [shape: f32[128,2], index: 1, kind: input, shape index: {}]   ;;  %s1514_s2 = inlined_call_operand.vmem [shape: f32[128,1], index: 2, kind: input, shape index: {}]   ;;  %s1515_s3 = inlined_call_operand.vmem [shape: f32[32,128], index: 3, kind: input, shape index: {}]   ;;  %s1516_s4 = inlined_call_operand.vmem [shape: f32[32,1], index: 4, kind: input, shape index: {}]   ;;  %s1517_s5 = inlined_call_operand.vmem [shape: f32[5,32], index: 5, kind: input, shape index: {}]   ;;  %s1518_s6 = inlined_call_operand.vmem [shape: f32[5,1], index: 6, kind: input, shape index: {}]   ;;  %s1519_s7 = inlined_call_operand.hbm [shape: f32[5,256], index: 7, kind: output, shape index: {}]  }
   0x1   :  { %14 = vsyncpa [#allocation3 + $0x1], 0  ;;  %s1210_s24 = smov 0   ;;  %s1212_s25 = smov 0  }
   0x2   :  { %s1214_s26 = smov 0   ;;  %s1216_s27 = smov 0  }
   0x3 LB: > { %s1231_s28 = sadd.s32 4294967295, %s1162_s27   ;;  %s911_s29 = sadd.s32 4294967294, %s1162_s27   ;;  %s1162_s27 = sphi %s1216_s27, %s1525_s27   ;;  %s1158_s26 = sphi %s1214_s26, %s1524_s26   ;;  %s1154_s25 = sphi %s1212_s25, %s1523_s25   ;;  %s1150_s24 = sphi %s1210_s24, %s1522_s24  }
   0x4   : > { %s1235_s30 = sadd.s32 1, %s1162_s27   ;;  %s179_s8 = sadd.s32 1, %s1158_s26 }
   0x5   : > { %s176_s9 = ssub.s32 %s1162_s27, %s1235_s30  ;;  %p189_p0 = scmp.ne.s32.totalorder %s1158_s26, %s1154_s25 }
   0x6   : > { %p177_p1 = scmp.eq.s32.totalorder %s176_s9, 0  ;;  %p190_p2 = scmp.eq.s32.totalorder %s1231_s28, 1 }
   0x7   : > { %p195_p3 = scmp.ne.s32.totalorder %s1154_s25, %s1150_s24  ;;  %p196_p4 = scmp.eq.s32.totalorder %s911_s29, 1 }
   0x8   : > { %s1246_s10 = scalar_select %p177_p1, %s1158_s26, %s179_s8  }
   0x9   : > { %p1248_p5 = por %p190_p2, %p189_p0  ;;  %p1252_p6 = por %p196_p4, %p195_p3 }
   0xa   : > { %p914_p7 = scmp.ge.s32.totalorder %s1162_s27, 1  ;;  %p239_p8 = scmp.lt.s32.totalorder %s1162_s27, 3 }
   0xc   : > { %p240_p9 = pnand %p914_p7, %p239_p8 }
   0xd   : > { %v277_v0 = vld [vmem:[%s1513_s1 + $0x10] sm:$0xff] (!%p240_p9)  ;;  %v275_v1 = vld [vmem:[%s1513_s1] sm:$0xff] (!%p240_p9)  ;;  %v1164_v2 = vmov (!%p240_p9), 1   ;;  %v276_v4 = vld [vmem:[%s1513_s1 + $0x8] sm:$0xff] (!%p240_p9)  ;;  %v1165_v7 = vmov (!%p240_p9), 0   ;;  %p270_p10 = scmp.lt.s32.totalorder (!%p240_p9), %s1231_s28, 1  ;;  %v371_v49 = vlaneseq (!%p240_p9) }
   0xe   : > { %243 = sbr.rel (%p240_p9) target bundleno = 796 (0x31c), region = 48  ;;  %1080 = vset.pattern.permute.xlu0 (!%p240_p9), %v1164_v2  ;;  %1078 = vset.pattern.permute.xlu1 (!%p240_p9), %v1164_v2  ;;  %v279_v3 = vld [vmem:[%s1513_s1 + $0x20] sm:$0xff] (!%p240_p9)  ;;  %v281_v5 = vld [vmem:[%s1513_s1 + $0x30] sm:$0xff] (!%p240_p9)  ;;  %v278_v6 = vld [vmem:[%s1513_s1 + $0x18] sm:$0xff] (!%p240_p9)  ;;  %vm1167_vm0 = vmmov (!%p240_p9), 0   ;;  %vm743_vm1 = vcmask (!%p240_p9), 261120  }
   0xf   : > { %400 = vperm.xlu0 (!%p240_p9), %1080, %v277_v0   ;;  %392 = vperm.xlu1 (!%p240_p9), %1078, %v275_v1   ;;  %v283_v8 = vld [vmem:[%s1513_s1 + $0x40] sm:$0xff] (!%p240_p9)  ;;  %v285_v9 = vld [vmem:[%s1513_s1 + $0x50] sm:$0xff] (!%p240_p9)  ;;  %v280_v13 = vld [vmem:[%s1513_s1 + $0x28] sm:$0xff] (!%p240_p9)  ;;  %v372_v52 = vshrl.u32 (!%p240_p9), %v371_v49, 7  ;;  %vm817_vm2 = vcmask (!%p240_p9), 1044480   ;;  %s267_s18 = sand.u32 (!%p240_p9), 1, %s1154_s25  }
  0x10   : > { %v491_v10 = vld [vmem:[%s1514_s2] sm:$0xff] (!%p240_p9)  ;;  %v1296_v12 = vld [vmem:[%s1513_s1 + $0x70] sm:$0xff] (!%p240_p9)  ;;  %v492_v15 = vld [vmem:[%s1514_s2 + $0x8] sm:$0xff] (!%p240_p9)  ;;  %s839_s9 = scalar_lea.sflag (!%p240_p9), [#allocation3], %s267_s18 }
  0x11   : > { %v287_v11 = vld [vmem:[%s1513_s1 + $0x60] sm:$0xff] (!%p240_p9)  ;;  %v493_v14 = vld [vmem:[%s1514_s2 + $0x10] sm:$0xff] (!%p240_p9)  ;;  %v494_v16 = vld [vmem:[%s1514_s2 + $0x18] sm:$0xff] (!%p240_p9)  ;;  %v457_v55 = vsub.s32 (!%p240_p9), 1, %v372_v52  ;;  %v373_v56 = vsub.s32 (!%p240_p9), 0, %v372_v52 }
  0x12   : > { %v282_v17 = vld [vmem:[%s1513_s1 + $0x38] sm:$0xff] (!%p240_p9)  ;;  %v496_v18 = vld [vmem:[%s1514_s2 + $0x28] sm:$0xff] (!%p240_p9)  ;;  %v495_v20 = vld [vmem:[%s1514_s2 + $0x20] sm:$0xff] (!%p240_p9) }
  0x13   : > { %408 = vperm.xlu0 (!%p240_p9), %1080, %v279_v3   ;;  %396 = vperm.xlu1 (!%p240_p9), %1078, %v276_v4   ;;  %v498_v19 = vld [vmem:[%s1514_s2 + $0x38] sm:$0xff] (!%p240_p9)  ;;  %v500_v21 = vld [vmem:[%s1514_s2 + $0x48] sm:$0xff] (!%p240_p9)  ;;  %v623_v25 = vld [vmem:[%s1516_s4] sm:$0xff] (!%p240_p9) }
  0x14   : > { %v502_v22 = vld [vmem:[%s1514_s2 + $0x58] sm:$0xff] (!%p240_p9)  ;;  %v284_v23 = vld [vmem:[%s1513_s1 + $0x48] sm:$0xff] (!%p240_p9)  ;;  %v497_v26 = vld [vmem:[%s1514_s2 + $0x30] sm:$0xff] (!%p240_p9) }
  0x15   : > { %v504_v24 = vld [vmem:[%s1514_s2 + $0x68] sm:$0xff]  ;;  %v625_v27 = vld [vmem:[%s1516_s4 + $0x10] sm:$0xff]  ;;  %v737_v28 = vld [vmem:[%s1518_s6] sm:$0x1f]  ;;  %s271_s19 = scalar_select %p270_p10, %s1231_s28, 1 }
  0x16   : > { %v286_v29 = vld [vmem:[%s1513_s1 + $0x58] sm:$0xff]  ;;  %v499_v30 = vld [vmem:[%s1514_s2 + $0x40] sm:$0xff]  ;;  %v288_v31 = vld [vmem:[%s1513_s1 + $0x68] sm:$0xff] }
  0x17   : > { %416 = vperm.xlu0 %1080, %v281_v5   ;;  %1079 = vset.pattern.permute.xlu1 %v1165_v7  ;;  %v501_v32 = vld [vmem:[%s1514_s2 + $0x50] sm:$0xff]  ;;  %v290_v33 = vld [vmem:[%s1513_s1 + $0x78] sm:$0xff]  ;;  %v503_v34 = vld [vmem:[%s1514_s2 + $0x60] sm:$0xff]  ;;  %s916_s20 = sshll.u32 %s271_s19, 1  ;;  %s915_s19 = sshll.u32 %s267_s18, 3 }
  0x18   : > { %308 = vperm.xlu1 %1079, %v278_v6   ;;  %v505_v37 = vld [vmem:[%s1514_s2 + $0x70] sm:$0xff]  ;;  %v506_v40 = vld [vmem:[%s1514_s2 + $0x78] sm:$0xff]  ;;  %v624_v43 = vld [vmem:[%s1516_s4 + $0x8] sm:$0xff]  ;;  %s273_s23 = scalar_lea.vmem %s1512_s0, %s916_s20  ;;  %s919_s20 = sshll.u32 %s1231_s28, 7 }
  0x19   : > { %v626_v45 = vld [vmem:[%s1516_s4 + $0x18] sm:$0xff]  ;;  %v619_v47 = vld [vmem:[%s1515_s3] sm:$0xff]  ;;  %s269_s21 = scalar_lea.vmem [#allocation2], %s915_s19  ;;  %s1470_s8 = scalar_lea.hbm %s1519_s7, %s919_s20 }
  0x1a   : > { %979 = vmatprep.mubr.f32.mxu0 %v619_v47  ;;  %v274_v57 = vld [vmem:[%s273_s23] sm:$0x3]  ;;  %s852_s22 = sshll.u32 %s269_s21, 4  ;;  %s1169_s28 = smov [#allocation2]   ;;  %s1472_s22 = int_to_ptr.vmem [resolvable:$true] %s852_s22 }
  0x1b   : > { %424 = vperm.xlu0 %1080, %v283_v8   ;;  %v1411_v60 = vrot.slane %v274_v57, %v457_v55  ;;  %v1413_v61 = vrot.slane %v274_v57, %v373_v56  ;;  %s1100_s13 = scalar_lea.vmem %s1472_s22, 128  ;;  %s1104_s14 = sshll.u32 %s1169_s28, 4  ;;  %s1105_s14 = int_to_ptr.vmem [resolvable:$false] %s1104_s14 }
  0x1c   : > { %1081 = vset.pattern.permute.xlu1 %v1164_v2  ;;  %p1101_p11 = scmp.ne.s32.totalorder %s1472_s22, %s1100_s13  ;;  %s1106_s15 = scalar_lea.vmem %s1105_s14, 256 }
  0x1d   : > { %404 = vperm.xlu1 %1081, %v278_v6   ;;  %p1107_p0 = scmp.lt.s32.totalorder %s1472_s22, %s1105_s14  ;;  %p1108_p1 = scmp.lt.s32.totalorder %s1106_s15, %s1100_s13 }
  0x1e   : > { %p1102_p12 = pnand %p1101_p11, %p1248_p5 }
  0x1f   : > { %432 = vperm.xlu0 %1080, %v285_v9   ;;  %p1109_p2 = por %p1108_p1, %p1107_p0 }
  0x20   : > { %p1103_p13 = pneg %p1102_p12 }
  0x21   : > { %1082 = vset.pattern.permute.xlu1 %v1165_v7 }
  0x22   : > { %509 = vperm.xlu1 %1082, %v491_v10   ;;  %p1110_p3 = pnand %p1109_p2, %p1103_p13 }
  0x23   : > { %440 = vperm.xlu0 %1080, %v287_v11  }
  0x26   : > { %313 = vperm.xlu1 %1082, %v279_v3  }
  0x27   : > { %448 = vperm.xlu0 %1080, %v1296_v12  }
  0x2a   : > { %318 = vperm.xlu1 %1082, %v280_v13  }
  0x2b   : > { %1093 = vset.pattern.permute.xlu0 %v1165_v7 }
  0x2c   : > { %293 = vperm.xlu0 %1093, %v275_v1  }
  0x2e   : > { %1083 = vset.pattern.permute.xlu1 %v1164_v2 }
  0x2f   : > { %412 = vperm.xlu1 %1083, %v280_v13  }
  0x30   : > { %298 = vperm.xlu0 %1093, %v276_v4  }
  0x33   : > { %1084 = vset.pattern.permute.xlu1 %v1165_v7 }
  0x34   : > { %303 = vperm.xlu0 %1093, %v277_v0   ;;  %519 = vperm.xlu1 %1084, %v493_v14  }
  0x38   : > { %514 = vperm.xlu0 %1093, %v492_v15   ;;  %323 = vperm.xlu1 %1084, %v281_v5  }
  0x3c   : > { %524 = vperm.xlu0 %1093, %v494_v16   ;;  %328 = vperm.xlu1 %1084, %v282_v17  }
  0x40   : > { %534 = vperm.xlu0 %1093, %v496_v18   ;;  %1085 = vset.pattern.permute.xlu1 %v1164_v2 }
  0x41   : > { %420 = vperm.xlu1 %1085, %v282_v17  }
  0x44   : > { %544 = vperm.xlu0 %1093, %v498_v19  }
  0x45   : > { %1086 = vset.pattern.permute.xlu1 %v1165_v7 }
  0x46   : > { %529 = vperm.xlu1 %1086, %v495_v20  }
  0x48   : > { %554 = vperm.xlu0 %1093, %v500_v21  }
  0x4a   : > { %333 = vperm.xlu1 %1086, %v283_v8  }
  0x4c   : > { %564 = vperm.xlu0 %1093, %v502_v22  }
  0x4e   : > { %338 = vperm.xlu1 %1086, %v284_v23  }
  0x50   : > { %574 = vperm.xlu0 %1093, %v504_v24  }
  0x52   : > { %1087 = vset.pattern.permute.xlu1 %v1164_v2 }
  0x53   : > { %428 = vperm.xlu1 %1087, %v284_v23  }
  0x54   : > { %629 = vperm.xlu0 %1093, %v623_v25  }
  0x57   : > { %1088 = vset.pattern.permute.xlu1 %v1165_v7 }
  0x58   : > { %539 = vperm.xlu1 %1088, %v497_v26   ;;  %639 = vperm.xlu0 %1093, %v625_v27  }
  0x5c   : > { %343 = vperm.xlu1 %1088, %v285_v9   ;;  %740 = vperm.xlu0 %1093, %v737_v28  }
  0x60   : > { %348 = vperm.xlu1 %1088, %v286_v29  }
  0x64   : > { %1089 = vset.pattern.permute.xlu1 %v1164_v2 }
  0x65   : > { %436 = vperm.xlu1 %1089, %v286_v29  }
  0x69   : > { %1090 = vset.pattern.permute.xlu1 %v1165_v7 }
  0x6a   : > { %549 = vperm.xlu1 %1090, %v499_v30  }
  0x6e   : > { %353 = vperm.xlu1 %1090, %v287_v11  }
  0x72   : > { %358 = vperm.xlu1 %1090, %v288_v31  }
  0x76   : > { %1091 = vset.pattern.permute.xlu1 %v1164_v2 }
  0x77   : > { %444 = vperm.xlu1 %1091, %v288_v31  }
  0x7b   : > { %1092 = vset.pattern.permute.xlu1 %v1165_v7 }
  0x7c   : > { %559 = vperm.xlu1 %1092, %v501_v32  }
  0x80   : > { %363 = vperm.xlu1 %1092, %v1296_v12  }
  0x84   : > { %368 = vperm.xlu1 %1092, %v290_v33  }
  0x88   : > { %1094 = vset.pattern.permute.xlu1 %v1164_v2 }
  0x89   : > { %452 = vperm.xlu1 %1094, %v290_v33  }
  0x8d   : > { %1095 = vset.pattern.permute.xlu1 %v1165_v7 }
  0x8e   : > { %569 = vperm.xlu1 %1095, %v503_v34   ;;  %v393_v35 = vpop.permute.xlu1 %392  ;;  %v401_v36 = vpop.permute.xlu0 %400 }
  0x8f   : > { %v459_v1 = vmul.f32 %v1411_v60, %v393_v35  ;;  %v461_v2 = vmul.f32 %v1411_v60, %v401_v36 }
  0x92   : > { %579 = vperm.xlu1 %1095, %v505_v37   ;;  %v397_v38 = vpop.permute.xlu1 %396  ;;  %v1382_v39 = vpop.permute.xlu0 %408 }
  0x93   : > { %v460_v7 = vmul.f32 %v1411_v60, %v397_v38  ;;  %v463_v28 = vmul.f32 %v1411_v60, %v1382_v39 }
  0x96   : > { %584 = vperm.xlu1 %1095, %v506_v40   ;;  %v1387_v41 = vpop.permute.xlu0 %416 }
  0x97   : > { %v309_v42 = vpop.permute.xlu1 %308  ;;  %v465_v49 = vmul.f32 %v1411_v60, %v1387_v41 }
  0x98   : > { %v378_v15 = vmul.f32 %v1413_v61, %v309_v42 }
  0x9a   : > { %634 = vperm.xlu1 %1095, %v624_v43   ;;  %v1392_v44 = vpop.permute.xlu0 %424 }
  0x9c   : > { %v405_v46 = vpop.permute.xlu1 %404 }
  0x9d   : > { %v462_v9 = vmul.f32 %v1411_v60, %v405_v46 }
  0x9e   : > { %644 = vperm.xlu1 %1095, %v626_v45   ;;  %v1401_v48 = vpop.permute.xlu0 %432 }
  0x9f   : > { %v478_v19 = vadd.f32 %v462_v9, %v378_v15 }
  0xa1   : > { %v510_v50 = vpop.permute.xlu1 %509 }
  0xa2   : > { %v1404_v51 = vpop.permute.xlu0 %440 }
  0xa5   : > { %v314_v53 = vpop.permute.xlu1 %313 }
  0xa6   : > { %v1409_v54 = vpop.permute.xlu0 %448  ;;  %v379_v29 = vmul.f32 %v1413_v61, %v314_v53 }
  0xa8   : > { %v479_v36 = vadd.f32 %v463_v28, %v379_v29 }
  0xa9   : > { %v319_v58 = vpop.permute.xlu1 %318 }
  0xaa   : > { %v380_v30 = vmul.f32 %v1413_v61, %v319_v58 }
  0xab   : > { %v294_v59 = vpop.permute.xlu0 %293 }
  0xac   : > { %v375_v62 = vmul.f32 %v1413_v61, %v294_v59 }
  0xae   : > { %v413_v63 = vpop.permute.xlu1 %412  ;;  %v475_v3 = vadd.f32 %v459_v1, %v375_v62 }
  0xaf   : > { %v299_v0 = vpop.permute.xlu0 %298  ;;  %v464_v25 = vmul.f32 %v1411_v60, %v413_v63 }
  0xb0   : > { %v376_v4 = vmul.f32 %v1413_v61, %v299_v0  ;;  %v587_v12 = vadd.f32 %v510_v50, %v475_v3 }
  0xb1   : > { %v480_v34 = vadd.f32 %v464_v25, %v380_v30 }
  0xb2   : > { %v476_v11 = vadd.f32 %v460_v7, %v376_v4  ;;  %v603_v20 = vmax.f32 %v587_v12, 0.0  ;;  %v467_v4 = vmul.f32 %v1411_v60, %v1392_v44 }
  0xb3   : > { %v304_v5 = vpop.permute.xlu0 %303  ;;  %v520_v6 = vpop.permute.xlu1 %519 }
  0xb4   : > { %v377_v8 = vmul.f32 %v1413_v61, %v304_v5 }
  0xb6   : > { %v477_v10 = vadd.f32 %v461_v2, %v377_v8 }
  0xb7   : > { %v515_v13 = vpop.permute.xlu0 %514  ;;  %v324_v14 = vpop.permute.xlu1 %323 }
  0xb8   : > { %v588_v16 = vadd.f32 %v515_v13, %v476_v11  ;;  %v589_v17 = vadd.f32 %v520_v6, %v477_v10  ;;  %v381_v50 = vmul.f32 %v1413_v61, %v324_v14 }
  0xba   : > { %v604_v18 = vmax.f32 %v588_v16, 0.0  ;;  %v605_v26 = vmax.f32 %v589_v17, 0.0  ;;  %v481_v57 = vadd.f32 %v465_v49, %v381_v50 }
  0xbb   : > { %v525_v21 = vpop.permute.xlu0 %524  ;;  %v329_v22 = vpop.permute.xlu1 %328 }
  0xbc   : > { %v590_v23 = vadd.f32 %v525_v21, %v478_v19  ;;  %v996_v24 = vpack.c.bf16 %v604_v18, %v603_v20  ;;  %v382_v47 = vmul.f32 %v1413_v61, %v329_v22  ;;  %v469_v22 = vmul.f32 %v1411_v60, %v1401_v48 }
  0xbe   : > { %v606_v27 = vmax.f32 %v590_v23, 0.0  ;;  %997 = vmatprep.subr.bf16.mxu0 %v996_v24 }
  0xbf   : > { %999 = vmatpush3.bf16.msra.mxu0 %v996_v24  ;;  %v535_v33 = vpop.permute.xlu0 %534 }
  0xc0   : > { %v1000_v31 = vpack.c.bf16 %v606_v27, %v605_v26  ;;  %v421_v32 = vpop.permute.xlu1 %420  ;;  %v592_v35 = vadd.f32 %v535_v33, %v480_v34 }
  0xc1   : > { %v466_v46 = vmul.f32 %v1411_v60, %v421_v32 }
  0xc2   : > { %1001 = vmatprep.subr.bf16.mxu0 %v1000_v31  ;;  %v608_v40 = vmax.f32 %v592_v35, 0.0 }
  0xc3   : > { %1003 = vmatpush3.bf16.msra.mxu0 %v1000_v31  ;;  %v482_v52 = vadd.f32 %v466_v46, %v382_v47  ;;  %v545_v55 = vpop.permute.xlu0 %544  ;;  %v473_v46 = vmul.f32 %v1411_v60, %v1409_v54  ;;  %v620_v54 = vld [vmem:[%s1515_s3 + $0x8] sm:$0xff] }
  0xc5   : > { %v530_v37 = vpop.permute.xlu1 %529  ;;  %v594_v56 = vadd.f32 %v545_v55, %v482_v52 }
  0xc6   : > { %v591_v38 = vadd.f32 %v530_v37, %v479_v36  ;;  %v471_v37 = vmul.f32 %v1411_v60, %v1404_v51 }
  0xc7   : > { %v610_v62 = vmax.f32 %v594_v56, 0.0  ;;  %v555_v8 = vpop.permute.xlu0 %554 }
  0xc8   : > { %v607_v42 = vmax.f32 %v591_v38, 0.0 }
  0xc9   : > { %v334_v43 = vpop.permute.xlu1 %333 }
  0xca   : > { %v1004_v45 = vpack.c.bf16 %v608_v40, %v607_v42  ;;  %v383_v5 = vmul.f32 %v1413_v61, %v334_v43 }
  0xcb   : > { %v565_v23 = vpop.permute.xlu0 %564 }
  0xcc   : > { %1005 = vmatprep.subr.bf16.mxu0 %v1004_v45  ;;  %v483_v10 = vadd.f32 %v467_v4, %v383_v5 }
  0xcd   : > { %v339_v39 = vpop.permute.xlu1 %338  ;;  %1007 = vmatpush3.bf16.msra.mxu0 %v1004_v45 }
  0xce   : > { %v384_v41 = vmul.f32 %v1413_v61, %v339_v39 }
  0xcf   : > { %v575_v38 = vpop.permute.xlu0 %574 }
  0xd2   : > { %v429_v53 = vpop.permute.xlu1 %428 }
  0xd3   : > { %v468_v3 = vmul.f32 %v1411_v60, %v429_v53 }
  0xd5   : > { %v484_v6 = vadd.f32 %v468_v3, %v384_v41  ;;  %v630_v41 = vpop.permute.xlu0 %629 }
  0xd7   : > { %v540_v58 = vpop.permute.xlu1 %539  ;;  %v596_v9 = vadd.f32 %v555_v8, %v484_v6 }
  0xd8   : > { %v593_v59 = vadd.f32 %v540_v58, %v481_v57 }
  0xd9   : > { %v612_v13 = vmax.f32 %v596_v9, 0.0 }
  0xda   : > { %v609_v63 = vmax.f32 %v593_v59, 0.0 }
  0xdb   : > { %v344_v0 = vpop.permute.xlu1 %343 }
  0xdc   : > { %v1008_v1 = vpack.c.bf16 %v610_v62, %v609_v63  ;;  %v385_v19 = vmul.f32 %v1413_v61, %v344_v0 }
  0xde   : > { %1009 = vmatprep.subr.bf16.mxu0 %v1008_v1  ;;  %v485_v25 = vadd.f32 %v469_v22, %v385_v19  ;;  %v736_v19 = vld [vmem:[%s1517_s5] sm:$0x1f] }
  0xdf   : > { %v349_v2 = vpop.permute.xlu1 %348  ;;  %1011 = vmatpush3.bf16.msra.mxu0 %v1008_v1  ;;  %v1166_v1 = vmov 0.0|0.0  }
  0xe0   : > { %v386_v44 = vmul.f32 %v1413_v61, %v349_v2  ;;  %1028 = vmatprep.subr.bf16.mxu1 %v1166_v1  ;;  %v1168_v2 = vmov 0.0  }
  0xe1   : > { %993 = vmatprep.mubr.msk.f32.mxu1 %vm1167_vm0, %v1168_v2 }
  0xe4   : > { %v437_v7 = vpop.permute.xlu1 %436 }
  0xe5   : > { %v470_v18 = vmul.f32 %v1411_v60, %v437_v7 }
  0xe7   : > { %v486_v20 = vadd.f32 %v470_v18, %v386_v44 }
  0xe9   : > { %v550_v11 = vpop.permute.xlu1 %549  ;;  %v598_v24 = vadd.f32 %v565_v23, %v486_v20 }
  0xea   : > { %v595_v12 = vadd.f32 %v550_v11, %v483_v10 }
  0xeb   : > { %v614_v29 = vmax.f32 %v598_v24, 0.0 }
  0xec   : > { %v611_v14 = vmax.f32 %v595_v12, 0.0  ;;  %v640_v12 = vpop.permute.xlu0 %639 }
  0xed   : > { %v354_v15 = vpop.permute.xlu1 %353 }
  0xee   : > { %v1012_v16 = vpack.c.bf16 %v612_v13, %v611_v14  ;;  %v387_v35 = vmul.f32 %v1413_v61, %v354_v15 }
  0xf0   : > { %1013 = vmatprep.subr.bf16.mxu0 %v1012_v16  ;;  %v487_v42 = vadd.f32 %v471_v37, %v387_v35  ;;  %v741_v20 = vpop.permute.xlu0 %740 }
  0xf1   : > { %v359_v17 = vpop.permute.xlu1 %358  ;;  %1015 = vmatpush3.bf16.msra.mxu0 %v1012_v16 }
  0xf2   : > { %v388_v34 = vmul.f32 %v1413_v61, %v359_v17 }
  0xf6   : > { %v445_v21 = vpop.permute.xlu1 %444 }
  0xf7   : > { %v472_v33 = vmul.f32 %v1411_v60, %v445_v21 }
  0xf9   : > { %v488_v36 = vadd.f32 %v472_v33, %v388_v34 }
  0xfb   : > { %v560_v26 = vpop.permute.xlu1 %559  ;;  %v600_v40 = vadd.f32 %v575_v38, %v488_v36 }
  0xfc   : > { %v597_v27 = vadd.f32 %v560_v26, %v485_v25 }
  0xfd   : > { %v616_v50 = vmax.f32 %v600_v40, 0.0 }
  0xfe   : > { %v613_v28 = vmax.f32 %v597_v27, 0.0 }
  0xff   : > { %v364_v30 = vpop.permute.xlu1 %363 }
 0x100   : > { %v1016_v31 = vpack.c.bf16 %v614_v29, %v613_v28  ;;  %v389_v45 = vmul.f32 %v1413_v61, %v364_v30 }
 0x102   : > { %1017 = vmatprep.subr.bf16.mxu0 %v1016_v31  ;;  %v489_v56 = vadd.f32 %v473_v46, %v389_v45 }
 0x103   : > { %v369_v32 = vpop.permute.xlu1 %368  ;;  %1019 = vmatpush3.bf16.msra.mxu0 %v1016_v31 }
 0x104   : > { %v390_v53 = vmul.f32 %v1413_v61, %v369_v32  ;;  %v622_v61 = vld [vmem:[%s1515_s3 + $0x18] sm:$0xff] }
 0x108   : > { %v453_v48 = vpop.permute.xlu1 %452 }
 0x109   : > { %v474_v47 = vmul.f32 %v1411_v60, %v453_v48  ;;  %v621_v60 = vld [vmem:[%s1515_s3 + $0x10] sm:$0xff] }
 0x10b   : > { %v490_v57 = vadd.f32 %v474_v47, %v390_v53 }
 0x10d   : > { %v570_v43 = vpop.permute.xlu1 %569 }
 0x10e   : > { %v599_v39 = vadd.f32 %v570_v43, %v487_v42 }
 0x110   : > { %v615_v49 = vmax.f32 %v599_v39, 0.0 }
 0x111   : > { %v580_v52 = vpop.permute.xlu1 %579 }
 0x112   : > { %v1020_v55 = vpack.c.bf16 %v616_v50, %v615_v49  ;;  %v601_v51 = vadd.f32 %v580_v52, %v489_v56 }
 0x114   : > { %1021 = vmatprep.subr.bf16.mxu0 %v1020_v55  ;;  %v617_v62 = vmax.f32 %v601_v51, 0.0 }
 0x115   : > { %v585_v58 = vpop.permute.xlu1 %584  ;;  %1023 = vmatpush3.bf16.msra.mxu0 %v1020_v55 }
 0x116   : > { %v602_v59 = vadd.f32 %v585_v58, %v490_v57 }
 0x118   : > { %v618_v63 = vmax.f32 %v602_v59, 0.0 }
 0x119   : > { %v635_v3 = vpop.permute.xlu1 %634 }
 0x11a   : > { %v1024_v0 = vpack.c.bf16 %v618_v63, %v617_v62 }
 0x11c   : > { %1025 = vmatprep.subr.bf16.mxu0 %v1024_v0 }
 0x11d   : > { %1027 = vmatpush3.bf16.msra.mxu0 %v1024_v0  ;;  %v645_v9 = vpop.permute.xlu1 %644 }
 0x120   : > { %980 = vmatmul.mubr.f32.vlgmr.msra.gmra.mrb[0].mxu0 %v620_v54 }
 0x121   : > { %982 = vmatprep.mubr.f32.mxu0 %v621_v60 }
 0x124   : > { %983 = vmatmul.mubr.f32.gmra.mrb[2].mxu0 %v622_v61 }
 0x1f3   : > { %v981_v4 = vpop.f32.mrb[0].mxu0 }
 0x1f4   : > { %v719_v5 = vadd.f32 %v981_v4, %v635_v3  ;;  %v713_v6 = vpop.f32.mrb[1].mxu0 }
 0x1f5   : > { %v714_v7 = vadd.f32 %v713_v6, %v630_v41 }
 0x1f6   : > { %v733_v8 = vmax.f32 %v719_v5, 0.0 }
 0x1f7   : > { %v732_v10 = vmax.f32 %v714_v7, 0.0  ;;  %v984_v11 = vpop.f32.mrb[2].mxu0 }
 0x1f8   : > { %v729_v13 = vadd.f32 %v984_v11, %v645_v9  ;;  %v723_v14 = vpop.f32.mrb[3].mxu0 }
 0x1f9   : > { %v724_v15 = vadd.f32 %v723_v14, %v640_v12  ;;  %v1029_v16 = vpack.c.bf16 %v733_v8, %v732_v10 }
 0x1fa   : > { %v735_v17 = vmax.f32 %v729_v13, 0.0 }
 0x1fb   : > { %v734_v18 = vmax.f32 %v724_v15, 0.0  ;;  %1030 = vmatpush3.bf16.msra.mxu1 %v1029_v16 }
 0x1fc   : > { %1031 = vmatprep.subr.bf16.mxu1 %v1166_v1 }
 0x1fd   : > { %v1032_v44 = vpack.c.bf16 %v735_v17, %v734_v18 }
 0x1ff   : > { %1033 = vmatpush3.bf16.msra.mxu1 %v1032_v44 }
 0x202   : > { %994 = vmatmul.mubr.msk.f32.vlgmr.msra.gmra.mrb[0].mxu1 %vm743_vm1, %v736_v19 }
 0x2d5   : > { %v813_v21 = vpop.f32.mrb[0].mxu1 }
 0x2d6   : > { %v814_v22 = vadd.f32 %v813_v21, %v741_v20  ;;  %v995_v23 = vpop.f32.mrb[1].mxu1 }
 0x2d8   : > { %v818_v24 = vsel %vm817_vm2, %v814_v22, -inf }
 0x2d9   : > { %v819_v25 = vrot.slane %v818_v24, 4 }
 0x2db   : > { %v820_v26 = vmax.f32 %v818_v24, %v819_v25 }
 0x2dd   : > { %v821_v27 = vrot.slane %v820_v26, 2 }
 0x2df   : > { %v822_v28 = vmax.f32 %v820_v26, %v821_v27 }
 0x2e1   : > { %v823_v29 = vrot.slane %v822_v28, 1 }
 0x2e3   : > { %v824_v30 = vmax.f32 %v822_v28, %v823_v29 }
 0x2e5   : > { %v825_v31 = vsub.f32 %v814_v22, %v824_v30 }
 0x2e7   : > { %v826_v32 = vmul.f32 1.442695, %v825_v31 }
 0x2e9   : > { %1096 = vpow2.f32 %v826_v32 }
 0x2f3   : > { %v1097_v33 = vpop.eup %1096 }
 0x2f4   : > { %v828_v34 = vsel %vm817_vm2, %v1097_v33, 0.0 }
 0x2f5   : > { %v829_v35 = vrot.slane %v828_v34, 4 }
 0x2f7   : > { %v830_v36 = vadd.f32 %v829_v35, %v828_v34 }
 0x2f9   : > { %v831_v48 = vrot.slane %v830_v36, 2 }
 0x2fb   : > { %v832_v37 = vadd.f32 %v831_v48, %v830_v36 }
 0x2fd   : > { %v833_v38 = vrot.slane %v832_v37, 1 }
 0x2ff   : > { %v834_v40 = vadd.f32 %v833_v38, %v832_v37 }
 0x301   : > { %1098 = vrcp.f32 %v834_v40 }
 0x30b   : > { %v1099_v42 = vpop.eup %1098 }
 0x30c   : > { %v836_v43 = vmul.f32 %v1099_v42, %v1097_v33 }
 0x30e   : > { %837 = vst [vmem:[%s269_s21] sm:$0x1f] %v836_v43 }
 0x30f   : > { %1113 = shalt.err (!%p1110_p3)
}
 0x310   : > { %s1114_s16 = scalar_lea.hbm %s1470_s8, 128  ;;  %s1118_s19 = scalar_lea.hbm %s1519_s7, 256 }
 0x311   : > { %p1115_p4 = scmp.ne.s32.totalorder %s1470_s8, %s1114_s16  ;;  %p1119_p9 = scmp.lt.u32.totalorder %s1470_s8, %s1519_s7 }
 0x312   : > { %p1120_p10 = scmp.lt.u32.totalorder %s1118_s19, %s1114_s16  ;;  %p1122_p12 = scmp.lt.u32.totalorder %s1114_s16, %s1470_s8 }
 0x313   : > { %p1116_p7 = pnand %p1115_p4, %p1248_p5 }
 0x314   : > { %p1121_p11 = por %p1120_p10, %p1119_p9 }
 0x315   : > { %p1117_p8 = pneg %p1116_p7 }
 0x316   : > { %p1123_p13 = por %p1122_p12, %p1121_p11 }
 0x318   : > { %p1124_p0 = pnand %p1123_p13, %p1117_p8 }
 0x31a   : > { %1127 = shalt.err (!%p1124_p0)
}
 0x31b   : > { %1034 = dma.vmem_to_hbm [thread:$0]  (%p1248_p5), %s1472_s22, 128, %s1470_s8, %s839_s9  }
 0x31c PF: > { %p1040_p1 = scmp.ge.s32.totalorder %s1162_s27, 2  ;;  %s864_s23 = sand.u32 1, %s1150_s24  }
 0x31d   : > { %s865_s29 = scalar_lea.sflag [#allocation3], %s864_s23 }
 0x31e   : > { %p1037_p2 = pnand %p1040_p1, %p1252_p6 }
 0x320   : > { %1145 = dma.done.wait (!%p1037_p2), %s865_s29, 128  }
 0x321   : > { %1147 = vsyncadd (!%p1037_p2), %s865_s29, 4294967168  ;;  %p17_p3 = scmp.ge.s32.totalorder %s1235_s30, 4   ;;  %s1522_s24 = smov %s1154_s25 }
 0x322   : > { %s1523_s25 = smov %s1158_s26  ;;  %s1524_s26 = smov %s1246_s10 }
 0x323   : > { %s1525_s27 = smov %s1235_s30  ;;  %19 = sbr.rel (!%p17_p3) target bundleno = 3 (0x3), region = 83 }
 0x32a   :  { %870 = vsyncpa [#allocation3], 1 }
 0x32b   :  { %872 = vsyncpa [#allocation3 + $0x1], 1 }

</bundles_post_ra>
